<compile_context>
chip_gen: v5e
topology: v5e:2x2
jax: 0.10.0
libtpu: 0.0.40
codegen_flags: <defaults>
</compile_context>

<pallas_src>
import functools
import math

import jax
import jax.numpy as jnp
from jax.experimental import pallas as pl
from jax.experimental.pallas import tpu as pltpu


def _label_smoothing_kernel(logp_ref, tgt_ref, out_ref, *,
                            chunk_rows, conf_minus_smooth, smoothing,
                            ent_row, ent_padcol_extra, padding_idx, pad_col):
    i = pl.program_id(1)   # inner ("arbitrary") axis: tiles owned by this core

    @pl.when(i == 0)
    def _():
        out_ref[...] = jnp.zeros_like(out_ref)

    tile_b, vocab = logp_ref.shape
    n_chunks = tile_b // chunk_rows

    cms = jnp.float32(conf_minus_smooth)      # confidence - smoothing_value
    s = jnp.float32(smoothing)                # smoothing_value
    e_row = jnp.float32(ent_row)              # conf*log(conf) + (V-2)*s*log(s)
    e_extra = jnp.float32(ent_padcol_extra)   # s*log(s)  (target == pad column case)
    pad_val = jnp.int32(padding_idx)
    pad_col_i = jnp.int32(pad_col)

    # Hoisted per-tile invariant (reused by every chunk).
    cols = jax.lax.broadcasted_iota(jnp.int32, (chunk_rows, vocab), 1)

    def chunk_body(g, acc):
        off = pl.multiple_of(g * chunk_rows, chunk_rows)
        logp = logp_ref[pl.ds(off, chunk_rows), :].astype(jnp.float32)   # (R, V)
        tgt = tgt_ref[pl.ds(off, chunk_rows), :]                         # (R, 1)

        # Hot path per element: one cmp + one select + the lane-reduce adds.
        is_tgt = cols == tgt
        tgt_logp = jnp.sum(jnp.where(is_tgt, logp, 0.0), axis=-1, keepdims=True)
        row_sum = jnp.sum(logp, axis=-1, keepdims=True)
        padcol_logp = logp[:, pad_col:pad_col + 1]        # static 1-lane slice

        # Row-granular corrections (cheap, (R, 1)):
        row_pad = tgt == pad_val                          # masked_fill_ rows
        tgt_is_padcol = jnp.logical_and(tgt == pad_col_i, jnp.logical_not(row_pad))

        # For a normal row:  E - (conf-s)*logp_t - s*(sum_v logp_v - logp_padcol)
        # If the target IS the pad column, scatter_ overrides the zero there:
        # add s*log(s) back to the entropy and remove the s*logp_padcol credit.
        loss = (e_row
                - cms * tgt_logp
                - s * (row_sum - padcol_logp)
                + jnp.where(tgt_is_padcol, e_extra - s * padcol_logp, 0.0))
        loss = jnp.where(row_pad, 0.0, loss)
        return acc + loss

    # Each chunk adds its per-row losses into the (chunk_rows, 1) partial held
    # in the output block (resident across the inner grid axis).  Accumulating
    # across chunk_rows slots (instead of a single scalar) also limits drift.
    out_ref[...] = jax.lax.fori_loop(0, n_chunks, chunk_body, out_ref[...],
                                     unroll=True)


class LabelSmoothingLossPallas:
    """Pallas port of the PyTorch LabelSmoothingLoss forward."""

    def __init__(self, label_smoothing, tgt_vocab_size, ignore_index=0):
        assert 0.0 < label_smoothing <= 1.0
        assert tgt_vocab_size > 2
        self.vocab = int(tgt_vocab_size)
        self.padding_idx = int(ignore_index)
        # PyTorch's `one_hot[self.padding_idx] = 0` wraps negative indices.
        self.pad_col = self.padding_idx % self.vocab
        self.confidence = 1.0 - label_smoothing
        self.smoothing_value = label_smoothing / (tgt_vocab_size - 2)
        ent_conf = (self.confidence * math.log(self.confidence)
                    if self.confidence > 0.0 else 0.0)
        ent_smooth = self.smoothing_value * math.log(self.smoothing_value)
        # Entropy of a normal (non-pad-row, target != pad-column) row, folded
        # into a single compile-time constant.
        self.ent_row = ent_conf + (self.vocab - 2) * ent_smooth
        # Extra entropy when the target IS the pad column (scatter_ overrides).
        self.ent_padcol_extra = ent_smooth

    # ---------------------------------------------------------------- tiling

    @staticmethod
    def _choose_tile_b(batch, vocab, itemsize, base,
                       buf_budget_bytes=2 << 20, min_steps=8):
        """Largest multiple-of-`base` divisor of `batch` that keeps each
        double-buffered input stream ~<= 2 MiB AND leaves >= `min_steps` grid
        steps (so DMA/compute overlap and the v7x 2-core split both fire)."""
        row_bytes = vocab * itemsize + 128 * 4   # logp row + lane-padded int32 target
        byte_cap = max(base, (buf_budget_bytes // row_bytes) // base * base)
        step_cap = max(base, (batch // min_steps) // base * base)
        cap = min(byte_cap, step_cap, batch)
        tile_b = base
        for d in range(base, cap + 1, base):
            if batch % d == 0:
                tile_b = d
        return tile_b

    @staticmethod
    def _choose_chunk(tile_b, vocab, base, chunk_elems=128 * 1024):
        """Rows per inner iteration: cover >= ~128 vregs of work so loop
        overhead is negligible even at small vocab; must divide tile_b."""
        want = ((chunk_elems + vocab - 1) // vocab + base - 1) // base * base
        want = max(base, want)
        chunk = base
        for d in range(base, tile_b + 1, base):
            if tile_b % d == 0 and d <= want:
                chunk = d
        return chunk

    # ---------------------------------------------------------------- forward

    def __call__(self, output, target, norm, *, tile_b=None):
        B, V = output.shape
        assert V == self.vocab
        itemsize = jnp.dtype(output.dtype).itemsize
        base = {4: 8, 2: 16, 1: 32}.get(itemsize, 8)   # native sublane tile height
        assert B % base == 0, f"batch must be a multiple of {base} for this dtype"
        # TODO(synk): ragged batches (B % base != 0) would need a masked tail tile.

        if tile_b is None:
            tile_b = self._choose_tile_b(B, V, itemsize, base)
        assert tile_b % base == 0 and B % tile_b == 0
        chunk = self._choose_chunk(tile_b, V, base)

        num_tiles = B // tile_b
        n_cores = 2 if (num_tiles >= 2 and num_tiles % 2 == 0) else 1
        tiles_per_core = num_tiles // n_cores

        tgt2d = target.astype(jnp.int32).reshape(B, 1)

        kernel = functools.partial(
            _label_smoothing_kernel,
            chunk_rows=chunk,
            conf_minus_smooth=self.confidence - self.smoothing_value,
            smoothing=self.smoothing_value,
            ent_row=self.ent_row,
            ent_padcol_extra=self.ent_padcol_extra,
            padding_idx=self.padding_idx,
            pad_col=self.pad_col,
        )

        # Honest VMEM accounting: double-buffered log-prob tiles, the
        # lane-padded (tile_b, 1) int32 target blocks, the lane-padded
        # (chunk, 1) output block, plus in-kernel per-chunk temporaries
        # (f32 cast, iota, mask, selects) and headroom.  With the 2 MiB tile
        # cap this stays far below v7x's 64 MiB physical VMEM.
        vmem_limit = (2 * tile_b * V * itemsize     # logp double-buffer
                      + 2 * tile_b * 128 * 4        # lane-padded target double-buffer
                      + 2 * chunk * 128 * 4         # lane-padded partial output
                      + 8 * chunk * V * 4           # in-kernel temporaries
                      + (4 << 20))                  # slack
        vmem_limit = int(max(vmem_limit, 16 << 20))

        partial = pl.pallas_call(
            kernel,
            out_shape=jax.ShapeDtypeStruct((n_cores * chunk, 1), jnp.float32),
            grid_spec=pltpu.PrefetchScalarGridSpec(
                num_scalar_prefetch=0,
                grid=(n_cores, tiles_per_core),
                in_specs=[
                    pl.BlockSpec((tile_b, V),
                                 lambda c, i: (c * tiles_per_core + i, 0)),
                    pl.BlockSpec((tile_b, 1),
                                 lambda c, i: (c * tiles_per_core + i, 0)),
                ],
                out_specs=pl.BlockSpec((chunk, 1), lambda c, i: (c, 0)),
            ),
            compiler_params=pltpu.CompilerParams(
                dimension_semantics=("parallel", "arbitrary"),
                vmem_limit_bytes=vmem_limit,
            ),
        )(output, tgt2d)

        # Tiny final reduction + .div(float(norm)) outside the kernel.
        return (jnp.sum(partial) / jnp.float32(norm)).astype(jnp.float32)


# --------------------------------------------------------------------- tests

def _reference(logp, target, label_smoothing, vocab, padding_idx, norm):
    s = label_smoothing / (vocab - 2)
    conf = 1.0 - label_smoothing
    one_hot = jnp.full((vocab,), s, dtype=jnp.float32).at[padding_idx].set(0.0)
    mp = jnp.tile(one_hot[None, :], (logp.shape[0], 1))
    mp = mp.at[jnp.arange(logp.shape[0]), target].set(conf)
    mp = jnp.where((target == padding_idx)[:, None], 0.0, mp)
    pos = mp > 0
    kl = jnp.where(pos, mp * (jnp.log(jnp.where(pos, mp, 1.0)) - logp), 0.0)
    return jnp.sum(kl) / norm


if __name__ == "__main__":
    B, V = 64, 256
    label_smoothing = 0.1
    padding_idx = 0
    norm = 13.0

    key = jax.random.PRNGKey(0)
    k_out, k_tgt = jax.random.split(key)

    # Model output is expected to be log-probabilities (F.kl_div convention).
    logits = jax.random.normal(k_out, (B, V), dtype=jnp.float32)
    output = jax.nn.log_softmax(logits, axis=-1)
    target = jax.random.randint(k_tgt, (B,), 0, V, dtype=jnp.int32)
    target = target.at[3].set(padding_idx)    # exercise the padding-row mask
    target = target.at[17].set(padding_idx)

    crit = LabelSmoothingLossPallas(label_smoothing, V, ignore_index=padding_idx)
    ref = _reference(output, target, label_smoothing, V, padding_idx, norm)

    # 1) auto tiling: tile_b=8, 8 tiles -> 2-core "parallel" axis, 4 steps/core
    loss = jax.block_until_ready(crit(output, target, norm))
    assert jnp.allclose(loss, ref, rtol=1e-3, atol=1e-3), (loss, ref)

    # 2) forced larger tile (multi-chunk inner loop path)
    loss_tiled = jax.block_until_ready(crit(output, target, norm, tile_b=16))
    assert jnp.allclose(loss_tiled, ref, rtol=1e-3, atol=1e-3), (loss_tiled, ref)

    # 3) bf16 log-probs (halves HBM traffic in real use; 16-row granularity)
    out_bf16 = output.astype(jnp.bfloat16)
    ref_bf16 = _reference(out_bf16.astype(jnp.float32), target,
                          label_smoothing, V, padding_idx, norm)
    loss_bf16 = jax.block_until_ready(crit(out_bf16, target, norm))
    assert jnp.allclose(loss_bf16, ref_bf16, rtol=1e-3, atol=1e-3), (loss_bf16, ref_bf16)

    print("KERNEL_OK")
</pallas_src>

<mosaic_0001>
module attributes {stable_mosaic.version = 11 : i64} {
  func.func @_label_smoothing_kernel(%arg0: i32, %arg1: i32, %arg2: memref<8x256xf32, #tpu.memory_space<vmem>>, %arg3: memref<8x1xi32, #tpu.memory_space<vmem>>, %arg4: memref<8x1xf32, #tpu.memory_space<vmem>>) attributes {dimension_semantics = [#tpu.dimension_semantics<parallel>, #tpu.dimension_semantics<arbitrary>], iteration_bounds = array<i64: 2, 4>, scalar_prefetch = 0 : i64, scratch_operands = 0 : i64, tpu.core_type = #tpu.core_type<tc>, window_params = [{transform_indices = @transform_0, window_bounds = array<i64: 8, 256>}, {transform_indices = @transform_1, window_bounds = array<i64: 8, 1>}, {transform_indices = @transform_2, window_bounds = array<i64: 8, 1>}]} {
    %c0_i32 = arith.constant 0 : i32
    %0 = arith.cmpi eq, %arg1, %c0_i32 : i32
    %1 = arith.extui %0 : i1 to i32
    %c0_i32_0 = arith.constant 0 : i32
    %2 = arith.cmpi ne, %1, %c0_i32_0 : i32
    scf.if %2 {
      %cst_18 = arith.constant 0.000000e+00 : f32
      %45 = vector.broadcast %cst_18 : f32 to vector<8x1xf32>
      %c0_19 = arith.constant 0 : index
      %c0_20 = arith.constant 0 : index
      %46 = vector.load %arg4[%c0_19, %c0_20] : memref<8x1xf32, #tpu.memory_space<vmem>>, vector<8x1xf32>
      tpu.vector_store %arg4[%c0_19, %c0_20], %45 {strides = array<i32>} : memref<8x1xf32, #tpu.memory_space<vmem>>, vector<8x1xf32>,
    } else {
    }
    %3 = tpu.iota {dimensions = array<i32: 1>} : vector<8x256xi32>
    %c0 = arith.constant 0 : index
    %c0_1 = arith.constant 0 : index
    %4 = vector.load %arg4[%c0, %c0_1] : memref<8x1xf32, #tpu.memory_space<vmem>>, vector<8x1xf32>
    %c0_i32_2 = arith.constant 0 : i32
    %c0_i32_3 = arith.constant 0 : i32
    %cst = arith.constant 0.899606287 : f32
    %cst_4 = arith.constant -0.878816425 : f32
    %cst_5 = arith.constant 3.93700786E-4 : f32
    %cst_6 = arith.constant -0.00308658252 : f32
    %c0_i32_7 = arith.constant 0 : i32
    %c8_i32 = arith.constant 8 : i32
    %5 = arith.muli %c0_i32_7, %c8_i32 : i32
    %6 = tpu.assume_multiple %5, 8 : i32
    %7 = arith.index_cast %6 : i32 to index
    %c0_8 = arith.constant 0 : index
    %8 = vector.load %arg2[%7, %c0_8] : memref<8x256xf32, #tpu.memory_space<vmem>>, vector<8x256xf32>
    %9 = arith.index_cast %6 : i32 to index
    %c0_9 = arith.constant 0 : index
    %10 = vector.load %arg3[%9, %c0_9] : memref<8x1xi32, #tpu.memory_space<vmem>>, vector<8x1xi32>
    %11 = vector.broadcast %10 : vector<8x1xi32> to vector<8x256xi32>
    %12 = arith.cmpi eq, %3, %11 : vector<8x256xi32>
    %cst_10 = arith.constant 0.000000e+00 : f32
    %13 = vector.broadcast %cst_10 : f32 to vector<8x256xf32>
    %14 = arith.select %12, %8, %13 : vector<8x256xi1>, vector<8x256xf32>
    %cst_11 = arith.constant dense<0.000000e+00> : vector<8xf32>
    %15 = vector.multi_reduction <add>, %14, %cst_11 [1] : vector<8x256xf32> to vector<8xf32>
    %16 = vector.shape_cast %15 : vector<8xf32> to vector<8x1xf32>
    %cst_12 = arith.constant dense<0.000000e+00> : vector<8xf32>
    %17 = vector.multi_reduction <add>, %8, %cst_12 [1] : vector<8x256xf32> to vector<8xf32>
    %18 = vector.shape_cast %17 : vector<8xf32> to vector<8x1xf32>
    %19 = vector.extract_strided_slice %8 {offsets = [0, 0], sizes = [8, 1], strides = [1, 1]} : vector<8x256xf32> to vector<8x1xf32>
    %20 = vector.broadcast %c0_i32_2 : i32 to vector<8x1xi32>
    %21 = arith.cmpi eq, %10, %20 : vector<8x1xi32>
    %22 = vector.broadcast %c0_i32_3 : i32 to vector<8x1xi32>
    %23 = arith.cmpi eq, %10, %22 : vector<8x1xi32>
    %cst_13 = arith.constant dense<true> : vector<8x1xi1>
    %24 = arith.xori %21, %cst_13 : vector<8x1xi1>
    %25 = arith.andi %23, %24 : vector<8x1xi1>
    %26 = vector.broadcast %cst : f32 to vector<8x1xf32>
    %27 = arith.mulf %26, %16 : vector<8x1xf32>
    %28 = vector.broadcast %cst_4 : f32 to vector<8x1xf32>
    %29 = arith.subf %28, %27 : vector<8x1xf32>
    %30 = arith.subf %18, %19 : vector<8x1xf32>
    %31 = vector.broadcast %cst_5 : f32 to vector<8x1xf32>
    %32 = arith.mulf %31, %30 : vector<8x1xf32>
    %33 = arith.subf %29, %32 : vector<8x1xf32>
    %34 = vector.broadcast %cst_5 : f32 to vector<8x1xf32>
    %35 = arith.mulf %34, %19 : vector<8x1xf32>
    %36 = vector.broadcast %cst_6 : f32 to vector<8x1xf32>
    %37 = arith.subf %36, %35 : vector<8x1xf32>
    %cst_14 = arith.constant 0.000000e+00 : f32
    %38 = vector.broadcast %cst_14 : f32 to vector<8x1xf32>
    %39 = arith.select %25, %37, %38 : vector<8x1xi1>, vector<8x1xf32>
    %40 = arith.addf %33, %39 : vector<8x1xf32>
    %cst_15 = arith.constant 0.000000e+00 : f32
    %41 = vector.broadcast %cst_15 : f32 to vector<8x1xf32>
    %42 = arith.select %21, %41, %40 : vector<8x1xi1>, vector<8x1xf32>
    %43 = arith.addf %4, %42 : vector<8x1xf32>
    %c1_i32 = arith.constant 1 : i32
    %c0_16 = arith.constant 0 : index
    %c0_17 = arith.constant 0 : index
    %44 = vector.load %arg4[%c0_16, %c0_17] : memref<8x1xf32, #tpu.memory_space<vmem>>, vector<8x1xf32>
    tpu.vector_store %arg4[%c0_16, %c0_17], %43 {strides = array<i32>} : memref<8x1xf32, #tpu.memory_space<vmem>>, vector<8x1xf32>,
    return
  }
  func.func @transform_0(%arg0: i32, %arg1: i32) -> (i32, i32) {
    %c4_i32 = arith.constant 4 : i32
    %0 = arith.muli %arg0, %c4_i32 : i32
    %1 = arith.addi %0, %arg1 : i32
    %c0_i32 = arith.constant 0 : i32
    %c0_i32_0 = arith.constant 0 : i32
    return %1, %c0_i32 : i32, i32
  }
  func.func @transform_1(%arg0: i32, %arg1: i32) -> (i32, i32) {
    %c4_i32 = arith.constant 4 : i32
    %0 = arith.muli %arg0, %c4_i32 : i32
    %1 = arith.addi %0, %arg1 : i32
    %c0_i32 = arith.constant 0 : i32
    %c0_i32_0 = arith.constant 0 : i32
    return %1, %c0_i32 : i32, i32
  }
  func.func @transform_2(%arg0: i32, %arg1: i32) -> (i32, i32) {
    %c0_i32 = arith.constant 0 : i32
    %c0_i32_0 = arith.constant 0 : i32
    return %arg0, %c0_i32 : i32, i32
  }
}

</mosaic_0001>

<bundles_post_ra>
// kernel: tpu_custom_call.1
= control target key start
LH: loop header
LB: loop body
LE: loop exit
PB: predicated region body
PF: predicated region fallthrough
CT: control target
= control target key end

     0   :  { %7 = vsyncpa [#allocation3], 0  ;;  %s675_s0 = inlined_call_operand.hbm [shape: f32[64,256], index: 0, kind: input, shape index: {}]   ;;  %s676_s1 = inlined_call_operand.vmem [shape: s32[64,1], index: 1, kind: input, shape index: {}]   ;;  %s677_s2 = inlined_call_operand.vmem [shape: f32[16,1], index: 2, kind: output, shape index: {}]  }
   0x1   :  { %9 = vsyncpa [#allocation3 + $0x1], 0  ;;  %s553_s9 = smov 0   ;;  %s555_s10 = smov 0  }
   0x2   :  { %s557_s11 = smov 0   ;;  %s559_s12 = smov 0  }
   0x3   :  { %s561_s13 = smov 0   ;;  %s563_s14 = smov 0  }
   0x4   :  { %s565_s15 = smov 0   ;;  %s567_s16 = smov 0  }
   0x5 LB: > { %s343_s17 = sadd.s32 4294967295, %s534_s16   ;;  %s24_s18 = sadd.s32 1, %s526_s14  ;;  %s534_s16 = sphi %s567_s16, %s15_s16   ;;  %s530_s15 = sphi %s565_s15, %s686_s15   ;;  %s526_s14 = sphi %s563_s14, %s685_s14   ;;  %s522_s13 = sphi %s561_s13, %s684_s13   ;;  %s518_s12 = sphi %s559_s12, %s683_s12   ;;  %s514_s11 = sphi %s557_s11, %s682_s11   ;;  %s510_s10 = sphi %s555_s10, %s681_s10   ;;  %s506_s9 = sphi %s553_s9, %s680_s9  }
   0x6   : > { %p25_p0 = scmp.ge.s32.totalorder %s24_s18, 4  ;;  %s27_s19 = sadd.s32 1, %s530_s15 }
   0x7   : > { %s345_s20 = sshll.u32 %s530_s15, 2  ;;  %s38_s21 = sadd.s32 1, %s514_s11 }
   0x8   : > { %s688_s18 = smov (%p25_p0, %s24_s18), 0  ;;  %s690_s19 = smov (!%p25_p0, %s27_s19), %s530_s15 }
   0x9   : > { %s32_s22 = sadd.s32 %s526_s14, %s345_s20  ;;  %p45_p1 = scmp.ne.s32.totalorder %s514_s11, %s510_s10 }
   0xa   : > { %p29_p2 = scmp.ge.s32.totalorder %s690_s19, 2  ;;  %p46_p3 = scmp.eq.s32.totalorder %s534_s16, 0 }
   0xb   : > { %p51_p4 = scmp.ne.s32.totalorder %s510_s10, %s506_s9  ;;  %p52_p5 = scmp.eq.s32.totalorder %s343_s17, 0 }
   0xc   : > { %s692_s19 = smov (%p29_p2, %s690_s19), 0  ;;  %p606_p6 = por %p46_p3, %p45_p1 }
   0xd   : > { %p610_p7 = por %p52_p5, %p51_p4  ;;  %s346_s25 = sshll.u32 %s692_s19, 2 }
   0xe   : > { %s34_s26 = sadd.s32 %s346_s25, %s688_s18  ;;  %p370_p8 = scmp.lt.s32.totalorder %s534_s16, 8 }
   0xf   : > { %s35_s27 = ssub.s32 %s32_s22, %s34_s26  ;;  %s131_s28 = sand.u32 1, %s514_s11  }
  0x10   : > { %p36_p9 = scmp.eq.s32.totalorder %s35_s27, 0  ;;  %s351_s29 = sshll.u32 %s131_s28, 4 }
  0x11   : > { %s363_s30 = sshll.u32 %s32_s22, 4  ;;  %s135_s8 = scalar_lea.vmem [#allocation2], %s351_s29 }
  0x12   : > { %s619_s3 = scalar_select %p36_p9, %s514_s11, %s38_s21  }
  0x13   : > { %s142_s6 = scalar_lea.hbm %s675_s0, %s363_s30  ;;  %s146_s9 = sshll.u32 %s135_s8, 4  ;;  %s147_s9 = int_to_ptr.vmem [resolvable:$true] %s146_s9 }
  0x14   : > { %s144_s7 = sshll.u32 %s142_s6, 4  ;;  %p367_p10 = pnand %p370_p8, %p606_p6  ;;  %s145_s7 = int_to_ptr.hbm [resolvable:$true] %s144_s7 }
  0x15   : > { %p355_p11 = scmp.ge.s32.totalorder %s534_s16, 1  ;;  %p162_p12 = scmp.lt.s32.totalorder %s534_s16, 9 }
  0x16   : > { %s132_s17 = scalar_lea.sflag [#allocation3], %s131_s28 }
  0x17   : > { %369 = dma.hbm_to_vmem [thread:$0]  (!%p367_p10), %s145_s7, 256, %s147_s9, %s132_s17  }
  0x18   : > { %p163_p13 = pnand %p355_p11, %p162_p12 }
  0x19   : > { %s168_s20 = sand.u32 (!%p163_p13), 1, %s510_s10  }
  0x1a   : > { %166 = sbr.rel (%p163_p13) target bundleno = 289 (0x121), region = 28  ;;  %s356_s21 = sshll.u32 (!%p163_p13), %s168_s20, 4 }
  0x1b   : > { %s169_s22 = scalar_lea.sflag (!%p163_p13), [#allocation3], %s168_s20  ;;  %s172_s25 = scalar_lea.vmem (!%p163_p13), [#allocation2], %s356_s21 }
  0x1f   : > { %501 = dma.done.wait (%p610_p7), %s169_s22, 256  }
  0x20   : > { %503 = vsyncadd (%p610_p7), %s169_s22, 4294967040  ;;  %s357_s23 = sshll.u32 %s522_s13, 2  ;;  %p209_p0 = scmp.lt.s32.totalorder %s522_s13, 1 }
  0x21   : > { %s202_s26 = sadd.s32 %s518_s12, %s357_s23  ;;  %p360_p2 = scmp.ne.s32.totalorder %s518_s12, 0 }
  0x22   : > { %p203_p1 = scmp.lt.s32.totalorder %s202_s26, 7  ;;  %s694_s13 = smov (!%p209_p0, %s522_s13), 1 }
  0x23   : > { %s359_s27 = sshll.u32 %s694_s13, 3  ;;  %216 = sbr.rel (%p360_p2) target bundleno = 42 (0x2a), region = 36 }
  0x24   : > { %s696_s26 = smov (!%p203_p1, %s202_s26), 7  ;;  %s642_s4 = scalar_lea.vmem %s677_s2, %s359_s27 }
  0x25   : > { %s358_s28 = sshll.u32 %s696_s26, 3 }
  0x26   : > { %s206_s6 = scalar_lea.vmem %s676_s1, %s358_s28 }
  0x28   : > { %vm217_vm0 = vcmask 7168   ;;  %v536_v0 = vmov 0.0  }
  0x29   : > { %218 = vst.msk [vmem:[%s642_s4] sm:$0xff] %vm217_vm0, %v536_v0 }
  0x2a PF: > { %v228_v1 = vld [vmem:[%s206_s6] sm:$0xff]  ;;  %v537_v2 = vmov 0   ;;  %v227_v4 = vld [vmem:[%s172_s25 + $0x8] sm:$0xff]  ;;  %v219_v6 = vlaneseq  ;;  %vm251_vm4 = vcmask 7168  }
  0x2b   : > { %437 = vset.pattern.permute.xlu0 %v537_v2  ;;  %v226_v3 = vld [vmem:[%s172_s25] sm:$0xff]  ;;  %vm242_vm3 = vcmp.eq.s32.totalorder %v228_v1, 0 }
  0x2c   : > { %230 = vperm.xlu0 %437, %v228_v1   ;;  %v239_v5 = vadd.f32 %v227_v4, %v226_v3  ;;  %v220_v7 = vand.u32 127, %v219_v6 }
  0x2e   : > { %240 = vadd.xlane.f32.xlu1 %v239_v5  ;;  %v221_v8 = vadd.s32 128, %v220_v7 }
  0x30   : > { %v222_v19 = vld [vmem:[%s642_s4] sm:$0xff] }
  0x9e   : > { %v231_v9 = vpop.permute.xlu0 %230 }
  0x9f   : > { %vm232_vm1 = vcmp.eq.s32.totalorder %v220_v7, %v231_v9  ;;  %vm233_vm2 = vcmp.eq.s32.totalorder %v221_v8, %v231_v9 }
  0xa0   : > { %v235_v10 = vsel %vm233_vm2, %v227_v4, 0.0  ;;  %v234_v11 = vsel %vm232_vm1, %v226_v3, 0.0 }
  0xa1   : > { %v236_v12 = vadd.f32 %v235_v10, %v234_v11  ;;  %v241_v13 = vpop.xlane.xlu1 %240 }
  0xa2   : > { %v245_v14 = vsub.f32 %v241_v13, %v226_v3 }
  0xa3   : > { %237 = vadd.xlane.f32.xlu0 %v236_v12 }
  0xa4   : > { %v246_v16 = vmul.f32 0.0003937008, %v245_v14 }
 0x116   : > { %v238_v15 = vpop.xlane.xlu0 %237 }
 0x117   : > { %v243_v17 = vmul.f32 0.8996063, %v238_v15 }
 0x119   : > { %v244_v18 = vsub.f32 -0.8788164, %v243_v17 }
 0x11b   : > { %v247_v20 = vsub.f32 %v244_v18, %v246_v16 }
 0x11d   : > { %v249_v21 = vsel %vm242_vm3, 0.0, %v247_v20 }
 0x11e   : > { %v250_v22 = vadd.f32 %v249_v21, %v222_v19 }
 0x120   : > { %252 = vst.msk [vmem:[%s642_s4] sm:$0xff] %vm251_vm4, %v250_v22 }
 0x121 PF: > { %s15_s16 = sadd.s32 1, %s534_s16   ;;  %s680_s9 = smov %s510_s10 }
 0x122   : > { %p12_p3 = scmp.ge.s32.totalorder %s15_s16, 10   ;;  %s681_s10 = smov %s514_s11 }
 0x123   : > { %s682_s11 = smov %s619_s3  ;;  %s683_s12 = smov %s526_s14 }
 0x124   : > { %s684_s13 = smov %s530_s15  ;;  %s685_s14 = smov %s688_s18 }
 0x125   : > { %s686_s15 = smov %s692_s19  ;;  %14 = sbr.rel (!%p12_p3) target bundleno = 5 (0x5), region = 76 }
 0x12a   :  { %272 = vsyncpa [#allocation3], 1 }
 0x12b   :  { %274 = vsyncpa [#allocation3 + $0x1], 1 }

</bundles_post_ra>
